<compile_context>
chip_gen: v6e
topology: v6e:2x2x1
jax: 0.10.0
libtpu: 0.0.40
codegen_flags: <defaults>
</compile_context>

<pallas_src>
import functools

import jax
import jax.numpy as jnp
from jax.experimental import pallas as pl
from jax.experimental.pallas import tpu as pltpu

LANE = 128
SUBLANE = 8
VMEM_BUDGET_BYTES = 24 * 1024 * 1024   # stay under v7x's 32 MiB scoped default
VMEM_LIMIT_BYTES = 32 * 1024 * 1024    # explicit limit (safe on v5e/v6e/v7x)


def _round_up(x, m):
    return (x + m - 1) // m * m


def _sublane_rows(dtype):
    # Packed sublane tile: 8 rows for 4-byte dtypes, 16 for bf16, 32 for int8.
    return SUBLANE * max(1, 4 // jnp.dtype(dtype).itemsize)


def _actor_kernel(max_action, hidden_tanh_dtype,
                  s_ref, w1_ref, b1_ref, w2_ref, b2_ref, w3_ref, b3_ref,
                  o_ref):
    w_dtype = w1_ref.dtype
    x = s_ref[...]                                           # (tile_b, state_dim)
    # fc1: f32 accumulation, f32 bias add, tanh in hidden_tanh_dtype.
    z1 = (jnp.dot(x, w1_ref[...], preferred_element_type=jnp.float32)
          + b1_ref[...].astype(jnp.float32))
    h1 = jnp.tanh(z1.astype(hidden_tanh_dtype)).astype(w_dtype)
    # fc2
    z2 = (jnp.dot(h1, w2_ref[...], preferred_element_type=jnp.float32)
          + b2_ref[...].astype(jnp.float32))
    h2 = jnp.tanh(z2.astype(hidden_tanh_dtype)).astype(w_dtype)
    # mean_layer + tanh squash + max_action scale (kept in f32).
    m = (jnp.dot(h2, w3_ref[...], preferred_element_type=jnp.float32)
         + b3_ref[...].astype(jnp.float32))
    o_ref[...] = (max_action * jnp.tanh(m)).astype(o_ref.dtype)


def prepare_params(params, compute_dtype=jnp.float32):
    """Pad weights/biases to 128-lane hidden width and cast. Call ONCE at init.

    `params` are logical arrays stored transposed relative to torch.nn.Linear,
    i.e. W is (in, out); biases are (1, out).  Only the hidden dimension is
    padded; state_dim and action_dim stay at their logical sizes so the batch
    I/O remains unpadded in HBM.
    """
    w1, b1, w2, b2, w3, b3 = params
    state_dim, hidden = w1.shape
    action_dim = w3.shape[1]
    hp = _round_up(hidden, LANE)
    dt = jnp.dtype(compute_dtype)

    def pad(x, rows, cols):
        x = x.astype(dt)
        return jnp.pad(x, ((0, rows - x.shape[0]), (0, cols - x.shape[1])))

    return (pad(w1, state_dim, hp), pad(b1, 1, hp),
            pad(w2, hp, hp),        pad(b2, 1, hp),
            pad(w3, hp, action_dim), pad(b3, 1, action_dim))


def actor_gaussian_forward(s, padded_params, max_action, *, tile_b=4096,
                           hidden_tanh_dtype=None, out_dtype=None):
    """Full Actor_Gaussian forward in one Pallas call.

    `padded_params` come from prepare_params() (padded/cast once at init).
    """
    w1, b1, w2, b2, w3, b3 = padded_params
    B, state_dim = s.shape
    assert w1.shape[0] == state_dim
    hp = w1.shape[1]
    action_dim = w3.shape[1]

    dtype = w1.dtype                       # storage / MXU-feed dtype
    itemsize = jnp.dtype(dtype).itemsize
    out_dtype = jnp.dtype(out_dtype) if out_dtype is not None else s.dtype
    hidden_tanh_dtype = (jnp.dtype(hidden_tanh_dtype)
                         if hidden_tanh_dtype is not None else jnp.dtype(jnp.float32))
    s = s.astype(dtype)

    # --- tile_b selection ----------------------------------------------------
    sub = _sublane_rows(dtype)
    # >= 2 grid steps when B allows, so the "parallel" batch axis can split
    # across v7x's two TensorCores (weights are tiny; per-core copies are free).
    tile_b = min(_round_up(tile_b, sub), _round_up(pl.cdiv(B, 2), sub))
    tile_b = max(tile_b, sub)

    def vmem_bytes(tb):
        io = 2 * tb * (state_dim + action_dim) * itemsize            # dbl-buffered s/out
        weights = 2 * (state_dim * hp + hp * hp + hp * action_dim
                       + 2 * hp + action_dim) * itemsize             # resident operands
        inter = 4 * tb * hp * 4                                      # f32 z1/h1/z2/h2
        return io + weights + inter

    while tile_b > sub and vmem_bytes(tile_b) > VMEM_BUDGET_BYTES:
        tile_b = max(sub, _round_up(tile_b // 2, sub))

    grid = (pl.cdiv(B, tile_b),)

    # Honest cost estimate: unpadded I/O bytes, padded-hidden flops.
    flops = 2 * B * (state_dim * hp + hp * hp + hp * action_dim)
    transcendentals = B * (2 * hp + action_dim)
    bytes_accessed = (B * (state_dim + action_dim) * itemsize
                      + (state_dim * hp + hp * hp + hp * action_dim
                         + 2 * hp + action_dim) * itemsize)

    def resident(shape):
        return pl.BlockSpec(shape, lambda i: (0, 0))

    kernel = functools.partial(_actor_kernel, float(max_action), hidden_tanh_dtype)
    return pl.pallas_call(
        kernel,
        out_shape=jax.ShapeDtypeStruct((B, action_dim), out_dtype),
        grid=grid,
        in_specs=[
            pl.BlockSpec((tile_b, state_dim), lambda i: (i, 0)),   # s: batch-tiled, unpadded
            resident((state_dim, hp)), resident((1, hp)),
            resident((hp, hp)),        resident((1, hp)),
            resident((hp, action_dim)), resident((1, action_dim)),
        ],
        out_specs=pl.BlockSpec((tile_b, action_dim), lambda i: (i, 0)),
        compiler_params=pltpu.CompilerParams(
            dimension_semantics=("parallel",),
            vmem_limit_bytes=VMEM_LIMIT_BYTES),
        cost_estimate=pl.CostEstimate(
            flops=int(flops), transcendentals=int(transcendentals),
            bytes_accessed=int(bytes_accessed)),
    )(s, w1, b1, w2, b2, w3, b3)


def init_params(key, state_dim, hidden_width, action_dim):
    """Orthogonal init matching the torch module's __init__.

    torch.nn.Linear weight is (out, in); we store the transpose (in, out) so
    the kernel computes x @ W.  Biases are zero (nn.init.constant_(bias, 0)).
    The module's log_std parameter is unused by forward() and omitted here.
    """
    k1, k2, k3 = jax.random.split(key, 3)
    ortho = jax.nn.initializers.orthogonal
    w1 = ortho(scale=1.0)(k1, (state_dim, hidden_width), jnp.float32)
    w2 = ortho(scale=1.0)(k2, (hidden_width, hidden_width), jnp.float32)
    w3 = ortho(scale=0.01)(k3, (hidden_width, action_dim), jnp.float32)
    b1 = jnp.zeros((1, hidden_width), jnp.float32)
    b2 = jnp.zeros((1, hidden_width), jnp.float32)
    b3 = jnp.zeros((1, action_dim), jnp.float32)
    return (w1, b1, w2, b2, w3, b3)


def reference_forward(s, params, max_action):
    w1, b1, w2, b2, w3, b3 = params
    h1 = jnp.tanh(s @ w1 + b1)
    h2 = jnp.tanh(h1 @ w2 + b2)
    return max_action * jnp.tanh(h2 @ w3 + b3)


if __name__ == "__main__":
    # Shapes consistent with the module: state_dim=16, hidden=32, action_dim=4.
    STATE_DIM, HIDDEN, ACTION_DIM = 16, 32, 4
    MAX_ACTION = 2.0

    key = jax.random.PRNGKey(0)
    k_in, k_p = jax.random.split(key)
    params = init_params(k_p, STATE_DIM, HIDDEN, ACTION_DIM)

    # Pad / cast weights once (would be done at module init in real use).
    params_f32 = prepare_params(params, jnp.float32)
    params_bf16 = prepare_params(params, jnp.bfloat16)

    # --- f32 path (v5e-safe default: f32 tanh), single grid step -------------
    B = 8
    s = jax.random.normal(k_in, (B, STATE_DIM), jnp.float32)
    mean = jax.block_until_ready(
        actor_gaussian_forward(s, params_f32, MAX_ACTION))
    ref = reference_forward(s, params, MAX_ACTION)
    assert mean.shape == (B, ACTION_DIM)
    assert jnp.allclose(mean, ref, atol=1e-5, rtol=1e-5), "f32 mismatch vs reference"

    # --- bf16 storage + bf16 hidden tanh (v6e/v7x rollout path), 2 grid steps
    B2 = 32
    s2 = jax.random.normal(k_in, (B2, STATE_DIM), jnp.float32)
    mean_bf16 = jax.block_until_ready(
        actor_gaussian_forward(s2, params_bf16, MAX_ACTION,
                               hidden_tanh_dtype=jnp.bfloat16))
    ref2 = reference_forward(s2, params, MAX_ACTION)
    assert mean_bf16.shape == (B2, ACTION_DIM)
    assert jnp.allclose(mean_bf16.astype(jnp.float32), ref2, atol=2e-2), \
        "bf16 mismatch vs reference"

    print("KERNEL_OK")
</pallas_src>

<mosaic_0001>
module attributes {stable_mosaic.version = 11 : i64} {
  func.func @_actor_kernel(%arg0: i32, %arg1: memref<8x16xf32, #tpu.memory_space<vmem>>, %arg2: memref<16x128xf32, #tpu.memory_space<vmem>>, %arg3: memref<1x128xf32, #tpu.memory_space<vmem>>, %arg4: memref<128x128xf32, #tpu.memory_space<vmem>>, %arg5: memref<1x128xf32, #tpu.memory_space<vmem>>, %arg6: memref<128x4xf32, #tpu.memory_space<vmem>>, %arg7: memref<1x4xf32, #tpu.memory_space<vmem>>, %arg8: memref<8x4xf32, #tpu.memory_space<vmem>>) attributes {dimension_semantics = [#tpu.dimension_semantics<parallel>], iteration_bounds = array<i64: 1>, scalar_prefetch = 0 : i64, scratch_operands = 0 : i64, tpu.core_type = #tpu.core_type<tc>, window_params = [{transform_indices = @transform_0, window_bounds = array<i64: 8, 16>}, {pipeline_mode = #tpu.pipeline_mode<synchronous>, transform_indices = @transform_1, window_bounds = array<i64: 16, 128>}, {pipeline_mode = #tpu.pipeline_mode<synchronous>, transform_indices = @transform_2, window_bounds = array<i64: 1, 128>}, {pipeline_mode = #tpu.pipeline_mode<synchronous>, transform_indices = @transform_3, window_bounds = array<i64: 128, 128>}, {pipeline_mode = #tpu.pipeline_mode<synchronous>, transform_indices = @transform_4, window_bounds = array<i64: 1, 128>}, {pipeline_mode = #tpu.pipeline_mode<synchronous>, transform_indices = @transform_5, window_bounds = array<i64: 128, 4>}, {pipeline_mode = #tpu.pipeline_mode<synchronous>, transform_indices = @transform_6, window_bounds = array<i64: 1, 4>}, {transform_indices = @transform_7, window_bounds = array<i64: 8, 4>}]} {
    %c0 = arith.constant 0 : index
    %c0_0 = arith.constant 0 : index
    %0 = vector.load %arg1[%c0, %c0_0] : memref<8x16xf32, #tpu.memory_space<vmem>>, vector<8x16xf32>
    %c0_1 = arith.constant 0 : index
    %c0_2 = arith.constant 0 : index
    %1 = vector.load %arg2[%c0_1, %c0_2] : memref<16x128xf32, #tpu.memory_space<vmem>>, vector<16x128xf32>
    %cst = arith.constant dense<0.000000e+00> : vector<8x128xf32>
    %2 = tpu.matmul %0, %1, %cst {dimension_numbers = #tpu.dot_dimension_numbers<[1], [0], [0], [1], [0, 0, 1, 1], [], []>} : vector<8x16xf32>, vector<16x128xf32>, vector<8x128xf32> -> vector<8x128xf32>
    %c0_3 = arith.constant 0 : index
    %c0_4 = arith.constant 0 : index
    %3 = vector.load %arg3[%c0_3, %c0_4] : memref<1x128xf32, #tpu.memory_space<vmem>>, vector<1x128xf32>
    %4 = vector.broadcast %3 : vector<1x128xf32> to vector<8x128xf32>
    %5 = arith.addf %2, %4 : vector<8x128xf32>
    %6 = math.tanh %5 : vector<8x128xf32>
    %c0_5 = arith.constant 0 : index
    %c0_6 = arith.constant 0 : index
    %7 = vector.load %arg4[%c0_5, %c0_6] : memref<128x128xf32, #tpu.memory_space<vmem>>, vector<128x128xf32>
    %cst_7 = arith.constant dense<0.000000e+00> : vector<8x128xf32>
    %8 = tpu.matmul %6, %7, %cst_7 {dimension_numbers = #tpu.dot_dimension_numbers<[1], [0], [0], [1], [0, 0, 1, 1], [], []>} : vector<8x128xf32>, vector<128x128xf32>, vector<8x128xf32> -> vector<8x128xf32>
    %c0_8 = arith.constant 0 : index
    %c0_9 = arith.constant 0 : index
    %9 = vector.load %arg5[%c0_8, %c0_9] : memref<1x128xf32, #tpu.memory_space<vmem>>, vector<1x128xf32>
    %10 = vector.broadcast %9 : vector<1x128xf32> to vector<8x128xf32>
    %11 = arith.addf %8, %10 : vector<8x128xf32>
    %12 = math.tanh %11 : vector<8x128xf32>
    %c0_10 = arith.constant 0 : index
    %c0_11 = arith.constant 0 : index
    %13 = vector.load %arg6[%c0_10, %c0_11] : memref<128x4xf32, #tpu.memory_space<vmem>>, vector<128x4xf32>
    %cst_12 = arith.constant dense<0.000000e+00> : vector<8x4xf32>
    %14 = tpu.matmul %12, %13, %cst_12 {dimension_numbers = #tpu.dot_dimension_numbers<[1], [0], [0], [1], [0, 0, 1, 1], [], []>} : vector<8x128xf32>, vector<128x4xf32>, vector<8x4xf32> -> vector<8x4xf32>
    %c0_13 = arith.constant 0 : index
    %c0_14 = arith.constant 0 : index
    %15 = vector.load %arg7[%c0_13, %c0_14] : memref<1x4xf32, #tpu.memory_space<vmem>>, vector<1x4xf32>
    %16 = vector.broadcast %15 : vector<1x4xf32> to vector<8x4xf32>
    %17 = arith.addf %14, %16 : vector<8x4xf32>
    %18 = math.tanh %17 : vector<8x4xf32>
    %cst_15 = arith.constant 2.000000e+00 : f32
    %19 = vector.broadcast %cst_15 : f32 to vector<8x4xf32>
    %20 = arith.mulf %19, %18 : vector<8x4xf32>
    %c0_16 = arith.constant 0 : index
    %c0_17 = arith.constant 0 : index
    %21 = vector.load %arg8[%c0_16, %c0_17] : memref<8x4xf32, #tpu.memory_space<vmem>>, vector<8x4xf32>
    tpu.vector_store %arg8[%c0_16, %c0_17], %20 {strides = array<i32>} : memref<8x4xf32, #tpu.memory_space<vmem>>, vector<8x4xf32>,
    return
  }
  func.func @transform_0(%arg0: i32) -> (i32, i32) {
    %c0_i32 = arith.constant 0 : i32
    %c0_i32_0 = arith.constant 0 : i32
    return %arg0, %c0_i32 : i32, i32
  }
  func.func @transform_1(%arg0: i32) -> (i32, i32) {
    %c0_i32 = arith.constant 0 : i32
    %c0_i32_0 = arith.constant 0 : i32
    %c0_i32_1 = arith.constant 0 : i32
    return %c0_i32, %c0_i32_0 : i32, i32
  }
  func.func @transform_2(%arg0: i32) -> (i32, i32) {
    %c0_i32 = arith.constant 0 : i32
    %c0_i32_0 = arith.constant 0 : i32
    %c0_i32_1 = arith.constant 0 : i32
    return %c0_i32, %c0_i32_0 : i32, i32
  }
  func.func @transform_3(%arg0: i32) -> (i32, i32) {
    %c0_i32 = arith.constant 0 : i32
    %c0_i32_0 = arith.constant 0 : i32
    %c0_i32_1 = arith.constant 0 : i32
    return %c0_i32, %c0_i32_0 : i32, i32
  }
  func.func @transform_4(%arg0: i32) -> (i32, i32) {
    %c0_i32 = arith.constant 0 : i32
    %c0_i32_0 = arith.constant 0 : i32
    %c0_i32_1 = arith.constant 0 : i32
    return %c0_i32, %c0_i32_0 : i32, i32
  }
  func.func @transform_5(%arg0: i32) -> (i32, i32) {
    %c0_i32 = arith.constant 0 : i32
    %c0_i32_0 = arith.constant 0 : i32
    %c0_i32_1 = arith.constant 0 : i32
    return %c0_i32, %c0_i32_0 : i32, i32
  }
  func.func @transform_6(%arg0: i32) -> (i32, i32) {
    %c0_i32 = arith.constant 0 : i32
    %c0_i32_0 = arith.constant 0 : i32
    %c0_i32_1 = arith.constant 0 : i32
    return %c0_i32, %c0_i32_0 : i32, i32
  }
  func.func @transform_7(%arg0: i32) -> (i32, i32) {
    %c0_i32 = arith.constant 0 : i32
    %c0_i32_0 = arith.constant 0 : i32
    return %arg0, %c0_i32 : i32, i32
  }
}

</mosaic_0001>

<bundles_post_ra>
// kernel: tpu_custom_call.1
= control target key start
LH: loop header
LB: loop body
LE: loop exit
PB: predicated region body
PF: predicated region fallthrough
CT: control target
= control target key end

     0   :  { %12 = vsyncpa [#allocation3], 0  ;;  %s708_s0 = inlined_call_operand.vmem [shape: f32[8,16], index: 0, kind: input, shape index: {}]   ;;  %s709_s1 = inlined_call_operand.hbm [shape: f32[16,128], index: 1, kind: input, shape index: {}]   ;;  %s710_s2 = inlined_call_operand.vmem [shape: f32[1,128], index: 2, kind: input, shape index: {}]   ;;  %s711_s3 = inlined_call_operand.vmem [shape: f32[128,128], index: 3, kind: input, shape index: {}]   ;;  %s712_s4 = inlined_call_operand.hbm [shape: f32[1,128], index: 4, kind: input, shape index: {}]   ;;  %s713_s5 = inlined_call_operand.vmem [shape: f32[128,4], index: 5, kind: input, shape index: {}]   ;;  %s714_s6 = inlined_call_operand.vmem [shape: f32[1,4], index: 6, kind: input, shape index: {}]   ;;  %s715_s7 = inlined_call_operand.vmem [shape: f32[8,4], index: 7, kind: output, shape index: {}]  }
   0x1   :  { %13 = vsyncpa [#allocation5], 0  ;;  %s508_s24 = smov [#allocation2]  }
   0x2   :  { %s21_s25 = sshll.u32 %s508_s24, 4  ;;  %s22_s25 = int_to_ptr.vmem [resolvable:$true] %s21_s25 }
   0x3   :  { %s472_s26 = scalar_lea.vmem %s22_s25, 256  ;;  %p477_p1 = scmp.lt.s32.totalorder %s22_s25, %s22_s25 }
   0x4   :  { %p473_p0 = scmp.ne.s32.totalorder %s22_s25, %s472_s26  ;;  %p478_p2 = scmp.lt.s32.totalorder %s472_s26, %s472_s26 }
   0x6   :  { %p479_p3 = por %p478_p2, %p477_p1 }
   0x8   :  { %p480_p4 = pnand %p479_p3, %p473_p0 }
   0xa   :  { %483 = shalt.err (!%p480_p4)
}
   0xb   :  { %s509_s27 = smov 128   ;;  %s510_s28 = smov 8  }
   0xc   :  { %27 = dma.hbm_to_vmem [thread:$0]  %s709_s1, 256, %s22_s25, [#allocation3], %s509_s27, %s509_s27, %s510_s28  }
   0xd   :  { %s511_s8 = smov [#allocation4]  }
   0xe   :  { %s38_s9 = sshll.u32 %s511_s8, 4  ;;  %s39_s9 = int_to_ptr.vmem [resolvable:$true] %s38_s9 }
   0xf   :  { %s492_s10 = scalar_lea.vmem %s39_s9, 16  ;;  %s496_s11 = scalar_lea.vmem %s39_s9, 32 }
  0x10   :  { %p493_p5 = scmp.ne.s32.totalorder %s39_s9, %s492_s10  ;;  %p497_p6 = scmp.lt.s32.totalorder %s39_s9, %s39_s9 }
  0x11   :  { %p498_p7 = scmp.lt.s32.totalorder %s496_s11, %s492_s10 }
  0x13   :  { %p499_p8 = por %p498_p7, %p497_p6 }
  0x15   :  { %p500_p9 = pnand %p499_p8, %p493_p5 }
  0x17   :  { %503 = shalt.err (!%p500_p9)
}
  0x18   :  { %41 = dma.hbm_to_vmem [thread:$0]  %s712_s4, 16, %s39_s9, [#allocation5]  }
  0x19   :  { %504 = dma.done.wait [#allocation3], 256  }
  0x1a   :  { %505 = vsyncadd [#allocation3], 4294967040 }
  0x1b   :  { %506 = dma.done.wait [#allocation5], 16  }
  0x1c   :  { %507 = vsyncadd [#allocation5], 4294967280  ;;  %v512_v0 = vmov 0.0   ;;  %vm513_vm0 = vmmov 0   ;;  %v54_v1 = vld [vmem:[#allocation2 + $0x8] sm:$0xff]  ;;  %v53_v2 = vld [vmem:[#allocation2] sm:$0xff] }
  0x1d   :  { %375 = vmatprep.subr.mxu0 %v512_v0  ;;  %379 = vmatprep.mubr.msk.f32.mxu0 %vm513_vm0, %v512_v0  ;;  %v52_v3 = vld [vmem:[%s708_s0] sm:$0xff]  ;;  %vm62_vm1 = vcmask 130048   ;;  %v152_v4 = vld [vmem:[%s711_s3 + $0x78] sm:$0xff]  ;;  %v151_v5 = vld [vmem:[%s711_s3 + $0x70] sm:$0xff]  ;;  %vm326_vm2 = vcmask 31744  }
  0x1e   :  { %382 = vmatprep.subr.mxu1 %v512_v0  ;;  %414 = vmatprep.mubr.msk.f32.mxu1 %vm513_vm0, %v512_v0  ;;  %v150_v6 = vld [vmem:[%s711_s3 + $0x68] sm:$0xff]  ;;  %v149_v7 = vld [vmem:[%s711_s3 + $0x60] sm:$0xff]  ;;  %v148_v8 = vld [vmem:[%s711_s3 + $0x58] sm:$0xff] }
  0x1f   :  { %376 = vmatpush3.msra.mxu0 %v54_v1  ;;  %383 = vmatpush3.msra.mxu1 %v152_v4  ;;  %v147_v9 = vld [vmem:[%s711_s3 + $0x50] sm:$0xff]  ;;  %v146_v10 = vld [vmem:[%s711_s3 + $0x48] sm:$0xff]  ;;  %v145_v11 = vld [vmem:[%s711_s3 + $0x40] sm:$0xff] }
  0x20   :  { %377 = vmatprep.subr.mxu0 %v512_v0  ;;  %384 = vmatprep.subr.mxu1 %v512_v0  ;;  %v144_v12 = vld [vmem:[%s711_s3 + $0x38] sm:$0xff]  ;;  %v143_v13 = vld [vmem:[%s711_s3 + $0x30] sm:$0xff]  ;;  %v142_v14 = vld [vmem:[%s711_s3 + $0x28] sm:$0xff] }
  0x21   :  { %378 = vmatpush3.msra.mxu0 %v53_v2  ;;  %385 = vmatpush3.msra.mxu1 %v151_v5  ;;  %v141_v15 = vld [vmem:[%s711_s3 + $0x20] sm:$0xff]  ;;  %v140_v16 = vld [vmem:[%s711_s3 + $0x18] sm:$0xff]  ;;  %v139_v17 = vld [vmem:[%s711_s3 + $0x10] sm:$0xff] }
  0x22   :  { %380 = vmatmul.mubr.msk.f32.vlgmr.msra.gmra.mxu0 %vm62_vm1, %v52_v3  ;;  %386 = vmatprep.subr.mxu1 %v512_v0  ;;  %v138_v18 = vld [vmem:[%s711_s3 + $0x8] sm:$0xff]  ;;  %v137_v19 = vld [vmem:[%s711_s3] sm:$0xff]  ;;  %v246_v20 = vld [vmem:[%s713_s5 + $0x78] sm:$0xff] }
  0x23   :  { %417 = vmatprep.subr.mxu0 %v512_v0  ;;  %387 = vmatpush3.msra.mxu1 %v150_v6  ;;  %v245_v21 = vld [vmem:[%s713_s5 + $0x70] sm:$0xff]  ;;  %v244_v22 = vld [vmem:[%s713_s5 + $0x68] sm:$0xff]  ;;  %v243_v23 = vld [vmem:[%s713_s5 + $0x60] sm:$0xff] }
  0x24   :  { %449 = vmatprep.mubr.msk.f32.mxu0 %vm513_vm0, %v512_v0  ;;  %388 = vmatprep.subr.mxu1 %v512_v0  ;;  %v242_v24 = vld [vmem:[%s713_s5 + $0x58] sm:$0xff]  ;;  %v241_v25 = vld [vmem:[%s713_s5 + $0x50] sm:$0xff]  ;;  %v240_v26 = vld [vmem:[%s713_s5 + $0x48] sm:$0xff] }
  0x25   :  { %389 = vmatpush3.msra.mxu1 %v149_v7  ;;  %418 = vmatpush3.msra.mxu0 %v246_v20  ;;  %v334_v27 = vld [vmem:[%s710_s2] ss:$0 sm:$0xff]  ;;  %v238_v33 = vld [vmem:[%s713_s5 + $0x38] sm:$0xff]  ;;  %v237_v34 = vld [vmem:[%s713_s5 + $0x30] sm:$0xff] }
  0x26   :  { %390 = vmatprep.subr.mxu1 %v512_v0  ;;  %419 = vmatprep.subr.mxu0 %v512_v0  ;;  %v239_v32 = vld [vmem:[%s713_s5 + $0x40] sm:$0xff]  ;;  %v236_v35 = vld [vmem:[%s713_s5 + $0x28] sm:$0xff]  ;;  %v234_v37 = vld [vmem:[%s713_s5 + $0x18] sm:$0xff] }
  0x27   :  { %391 = vmatpush3.msra.mxu1 %v148_v8  ;;  %420 = vmatpush3.msra.mxu0 %v245_v21  ;;  %v235_v36 = vld [vmem:[%s713_s5 + $0x20] sm:$0xff]  ;;  %v233_v38 = vld [vmem:[%s713_s5 + $0x10] sm:$0xff]  ;;  %v232_v39 = vld [vmem:[%s713_s5 + $0x8] sm:$0xff] }
  0x28   :  { %392 = vmatprep.subr.mxu1 %v512_v0  ;;  %421 = vmatprep.subr.mxu0 %v512_v0  ;;  %v231_v40 = vld [vmem:[%s713_s5] sm:$0xff]  ;;  %v336_v41 = vld [vmem:[#allocation4] ss:$0 sm:$0xff] }
  0x29   :  { %393 = vmatpush3.msra.mxu1 %v147_v9  ;;  %422 = vmatpush3.msra.mxu0 %v244_v22  ;;  %v337_v46 = vld [vmem:[%s714_s6] ss:$0 sm:$0xff] }
  0x2a   :  { %394 = vmatprep.subr.mxu1 %v512_v0  ;;  %423 = vmatprep.subr.mxu0 %v512_v0 }
  0x2b   :  { %395 = vmatpush3.msra.mxu1 %v146_v10  ;;  %424 = vmatpush3.msra.mxu0 %v243_v23 }
  0x2c   :  { %396 = vmatprep.subr.mxu1 %v512_v0  ;;  %425 = vmatprep.subr.mxu0 %v512_v0 }
  0x2d   :  { %397 = vmatpush3.msra.mxu1 %v145_v11  ;;  %426 = vmatpush3.msra.mxu0 %v242_v24 }
  0x2e   :  { %398 = vmatprep.subr.mxu1 %v512_v0  ;;  %427 = vmatprep.subr.mxu0 %v512_v0 }
  0x2f   :  { %399 = vmatpush3.msra.mxu1 %v144_v12  ;;  %428 = vmatpush3.msra.mxu0 %v241_v25 }
  0x30   :  { %400 = vmatprep.subr.mxu1 %v512_v0  ;;  %429 = vmatprep.subr.mxu0 %v512_v0 }
  0x31   :  { %401 = vmatpush3.msra.mxu1 %v143_v13  ;;  %430 = vmatpush3.msra.mxu0 %v240_v26 }
  0x32   :  { %402 = vmatprep.subr.mxu1 %v512_v0  ;;  %431 = vmatprep.subr.mxu0 %v512_v0 }
  0x33   :  { %403 = vmatpush3.msra.mxu1 %v142_v14  ;;  %432 = vmatpush3.msra.mxu0 %v239_v32 }
  0x34   :  { %404 = vmatprep.subr.mxu1 %v512_v0  ;;  %433 = vmatprep.subr.mxu0 %v512_v0 }
  0x35   :  { %405 = vmatpush3.msra.mxu1 %v141_v15  ;;  %434 = vmatpush3.msra.mxu0 %v238_v33 }
  0x36   :  { %406 = vmatprep.subr.mxu1 %v512_v0  ;;  %435 = vmatprep.subr.mxu0 %v512_v0 }
  0x37   :  { %407 = vmatpush3.msra.mxu1 %v140_v16  ;;  %436 = vmatpush3.msra.mxu0 %v237_v34 }
  0x38   :  { %408 = vmatprep.subr.mxu1 %v512_v0  ;;  %437 = vmatprep.subr.mxu0 %v512_v0 }
  0x39   :  { %409 = vmatpush3.msra.mxu1 %v139_v17  ;;  %438 = vmatpush3.msra.mxu0 %v236_v35 }
  0x3a   :  { %410 = vmatprep.subr.mxu1 %v512_v0  ;;  %439 = vmatprep.subr.mxu0 %v512_v0 }
  0x3b   :  { %411 = vmatpush3.msra.mxu1 %v138_v18  ;;  %440 = vmatpush3.msra.mxu0 %v235_v36 }
  0x3c   :  { %412 = vmatprep.subr.mxu1 %v512_v0  ;;  %441 = vmatprep.subr.mxu0 %v512_v0 }
  0x3d   :  { %413 = vmatpush3.msra.mxu1 %v137_v19  ;;  %442 = vmatpush3.msra.mxu0 %v234_v37 }
  0x3e   :  { %443 = vmatprep.subr.mxu0 %v512_v0 }
  0x3f   :  { %444 = vmatpush3.msra.mxu0 %v233_v38 }
  0x40   :  { %445 = vmatprep.subr.mxu0 %v512_v0 }
  0x41   :  { %446 = vmatpush3.msra.mxu0 %v232_v39 }
  0x42   :  { %447 = vmatprep.subr.mxu0 %v512_v0 }
  0x43   :  { %448 = vmatpush3.msra.mxu0 %v231_v40 }
  0xe2   :  { %v132_v28 = vpop.f32.mrf.mxu0 }
  0xe3   :  { %v133_v29 = vadd.f32 %v334_v27, %v132_v28 }
  0xe4   :  { %v381_v30 = vpop.f32.mrf.mxu0 }
  0xe5   :  { %458 = vtanh.f32 %v133_v29 }
  0xf2   :  { %v459_v31 = vpop.eup %458 }
  0xf3   :  { %415 = vmatmul.mubr.f32.vlgmr.msra.gmra.mxu1 %v459_v31 }
 0x1b3   :  { %v226_v42 = vpop.f32.mrf.mxu1 }
 0x1b4   :  { %v227_v43 = vadd.f32 %v336_v41, %v226_v42 }
 0x1b5   :  { %v416_v44 = vpop.f32.mrf.mxu1 }
 0x1b6   :  { %460 = vtanh.f32 %v227_v43 }
 0x1c3   :  { %v461_v45 = vpop.eup %460 }
 0x1c4   :  { %450 = vmatmul.mubr.f32.vlgmr.msra.gmra.mxu0 %v461_v45 }
 0x284   :  { %v320_v47 = vpop.f32.mrf.mxu0 }
 0x285   :  { %v321_v48 = vadd.f32 %v337_v46, %v320_v47 }
 0x286   :  { %v451_v49 = vpop.f32.mrf.mxu0 }
 0x287   :  { %462 = vtanh.f32 %v321_v48 }
 0x294   :  { %v463_v50 = vpop.eup %462 }
 0x295   :  { %v325_v51 = vmul.f32 2.0, %v463_v50 }
 0x297   :  { %327 = vst.msk [vmem:[%s715_s7] sm:$0xff] %vm326_vm2, %v325_v51 }
 0x298   :  { %332 = vsyncpa [#allocation3], 1 }
 0x299   :  { %333 = vsyncpa [#allocation5], 1 }

</bundles_post_ra>
